<compile_context>
chip_gen: v5e
topology: v5e:2x2
jax: 0.10.0
libtpu: 0.0.40
codegen_flags: <defaults>
</compile_context>

<pallas_src>
import jax
import jax.numpy as jnp
from jax.experimental import pallas as pl
from jax.experimental.pallas import tpu as pltpu


_LANE = 128                       # TPU lane width; batch tiles are multiples of this
_MAX_TB = 2048                    # upper bound on the batch tile (rows)
_VMEM_LIMIT = 32 * 1024 * 1024    # explicit scoped-VMEM budget (safe v5e..v7x)


def _round_up(x, m):
    return (x + m - 1) // m * m


def _choose_tiling(batch, d_obs, d_act):
    """Pick (batch_tile, padded_batch).

    The tile is the largest multiple of 128 (<= _MAX_TB) whose double-buffered
    obs+act input slabs stay well inside scoped VMEM; when more than one tile
    is needed the tile is a multiple of 1024 so the (TB//128, 128) output block
    keeps an 8-aligned sublane dimension.
    """
    row_bytes = 4 * max(d_obs + d_act, 1)
    cap = max(1024, ((8 * 1024 * 1024) // (2 * row_bytes)) // 1024 * 1024)
    tb_max = min(_MAX_TB, cap)
    if batch <= tb_max:
        tb = _round_up(max(batch, 1), _LANE)
    else:
        tb = tb_max
    return tb, _round_up(max(batch, 1), tb)


def _make_critic_kernel(n_hidden):
    """Fused per-agent critic MLP kernel (static hidden-layer count)."""

    def _body(obs_ref, act_ref, w0o_ref, w0a_ref, small_ref, wh_ref, o_ref):
        rows, lanes = o_ref.shape            # (TB // 128, 128)
        hdim = small_ref.shape[-1]
        b0 = small_ref[0:1, :]               # (1, H)
        wq = small_ref[1:2, :]               # (1, H)  (q-head weights as a row)
        bq = small_ref[2:3, 0:1]             # (1, 1)

        # fc_obs_action on the split (obs | act) input + ReLU (no concat needed)
        h = (jnp.dot(obs_ref[...], w0o_ref[...], preferred_element_type=jnp.float32)
             + jnp.dot(act_ref[...], w0a_ref[...], preferred_element_type=jnp.float32)
             + b0)
        h = jnp.maximum(h, 0.0)

        # hidden stack, statically unrolled (hidden_layer_count is small/fixed)
        for j in range(n_hidden):
            h = (jnp.dot(h, wh_ref[j], preferred_element_type=jnp.float32)
                 + small_ref[3 + j:4 + j, :])
            h = jnp.maximum(h, 0.0)

        # q head: VPU multiply + lane reduction, emitted directly in the
        # lane-dense (TB//128, 128) output layout.  The sublane split of the
        # batch tile is layout-preserving; the reduction's sublane->lane
        # packing is the one small XLU relayout.
        h3 = h.reshape(rows, lanes, hdim)
        q = jnp.sum(h3 * wq, axis=-1) + bq   # (rows, 128)
        o_ref[...] = q.astype(o_ref.dtype)

    if n_hidden > 0:
        def kernel(obs_ref, act_ref, w0o_ref, w0a_ref, small_ref, wh_ref, o_ref):
            _body(obs_ref, act_ref, w0o_ref, w0a_ref, small_ref, wh_ref, o_ref)
    else:
        def kernel(obs_ref, act_ref, w0o_ref, w0a_ref, small_ref, o_ref):
            _body(obs_ref, act_ref, w0o_ref, w0a_ref, small_ref, None, o_ref)

    return kernel


def critic_forward_fused(obs, act, fused_params, hidden_layer_count, batch_tile):
    """All-agent fused critic forward.

    obs : (A, B_pad, Do_max) f32, zero-padded per agent, B_pad % batch_tile == 0
    act : (A, B_pad, Da_max) f32
    returns (A, B_pad) f32 q-values.
    """
    A, B_pad, Do = obs.shape
    Da = act.shape[-1]
    H = fused_params["small"].shape[-1]
    L = hidden_layer_count
    TB = batch_tile
    assert TB % _LANE == 0 and B_pad % TB == 0
    n_bt = B_pad // TB
    rows = TB // _LANE

    def x_spec(d):
        # activations: blocked over (agent, batch-tile), full feature dim
        return pl.BlockSpec((None, TB, d), lambda i, bt: (i, bt, 0))

    def w_spec(per_agent_shape):
        # weights: agent i's slab, constant over the (inner) batch-tile axis so
        # the slab stays VMEM-resident while sweeping batch tiles.
        nd = len(per_agent_shape)
        return pl.BlockSpec((None,) + tuple(per_agent_shape),
                            lambda i, bt: (i,) + (0,) * nd)

    in_specs = [x_spec(Do), x_spec(Da),
                w_spec((Do, H)), w_spec((Da, H)), w_spec((3 + L, H))]
    args = [obs, act, fused_params["w0_obs"], fused_params["w0_act"],
            fused_params["small"]]
    if L > 0:
        in_specs.append(w_spec((L, H, H)))
        args.append(fused_params["wh"])

    out = pl.pallas_call(
        _make_critic_kernel(L),
        out_shape=jax.ShapeDtypeStruct((A, B_pad // _LANE, _LANE), jnp.float32),
        grid=(A, n_bt),
        in_specs=in_specs,
        out_specs=pl.BlockSpec((None, rows, _LANE), lambda i, bt: (i, bt, 0)),
        compiler_params=pltpu.CompilerParams(
            # agent axis is the megacore-sharded one (v7x: 2 TCs); batch tiles
            # stay sequential per core so weights remain VMEM-resident.
            dimension_semantics=("parallel", "arbitrary"),
            vmem_limit_bytes=_VMEM_LIMIT),
    )(*args)
    return out.reshape(A, B_pad)


class CriticDNNPallas:
    """JAX/Pallas port of CriticDNN.

    Parameters are created deterministically with PyTorch nn.Linear default
    init and stored both per-agent (for the plain-JAX reference) and stacked /
    zero-padded (for the fused kernel). Weights are stored (in_dim, out_dim)
    so y = x @ W + b, which matches torch's y = x @ W_t.T + b semantically.
    """

    def __init__(self, agent_count, observation_dim_list, action_dim_list,
                 hidden_dim, hidden_layer_count, key):
        self.agent_count = agent_count
        self.observation_dim_list = list(observation_dim_list)
        self.action_dim_list = list(action_dim_list)
        self.hidden_dim = hidden_dim
        self.hidden_layer_count = hidden_layer_count
        self.obs_dim_max = max(observation_dim_list)
        self.act_dim_max = max(action_dim_list)

        H, L = hidden_dim, hidden_layer_count
        Do, Da = self.obs_dim_max, self.act_dim_max

        self.params = []  # per-agent, unpadded (reference path)
        w0o_s, w0a_s, small_s, wh_s = [], [], [], []

        keys = jax.random.split(key, agent_count)
        for i in range(agent_count):
            d_obs = self.observation_dim_list[i]
            d_act = self.action_dim_list[i]
            d_in = d_obs + d_act
            k = jax.random.split(keys[i], 2 * (L + 2))
            kit = iter(k)

            def _linear(key_w, key_b, fan_in, fan_out):
                # PyTorch nn.Linear default: U(-1/sqrt(fan_in), 1/sqrt(fan_in))
                bound = 1.0 / (float(fan_in) ** 0.5)
                w = jax.random.uniform(key_w, (fan_in, fan_out), jnp.float32,
                                       -bound, bound)
                b = jax.random.uniform(key_b, (fan_out,), jnp.float32,
                                       -bound, bound)
                return w, b

            w0, b0 = _linear(next(kit), next(kit), d_in, H)
            wh_list, bh_list = [], []
            for _ in range(L):
                w, b = _linear(next(kit), next(kit), H, H)
                wh_list.append(w)
                bh_list.append(b)
            wq, bq = _linear(next(kit), next(kit), H, 1)

            self.params.append(dict(w0=w0, b0=b0, wh=wh_list, bh=bh_list,
                                    wq=wq, bq=bq))

            # ---- fused / padded views (agent-stacked) -----------------------
            w0_obs = jnp.zeros((Do, H), jnp.float32).at[:d_obs].set(w0[:d_obs])
            w0_act = jnp.zeros((Da, H), jnp.float32).at[:d_act].set(w0[d_obs:])
            w0o_s.append(w0_obs)
            w0a_s.append(w0_act)

            # pack all tiny per-agent operands into one (3+L, H) slab:
            #   row 0: b0, row 1: wq (as a row), row 2: [bq, 0...], rows 3+: bh_j
            small = jnp.zeros((3 + L, H), jnp.float32)
            small = small.at[0].set(b0)
            small = small.at[1].set(wq[:, 0])
            small = small.at[2, 0].set(bq[0])
            for j in range(L):
                small = small.at[3 + j].set(bh_list[j])
            small_s.append(small)

            if L > 0:
                wh_s.append(jnp.stack(wh_list, axis=0))          # (L, H, H)

        self.fused = dict(
            w0_obs=jnp.stack(w0o_s, 0),    # (A, Do, H)
            w0_act=jnp.stack(w0a_s, 0),    # (A, Da, H)
            small=jnp.stack(small_s, 0),   # (A, 3+L, H)
        )
        if L > 0:
            self.fused["wh"] = jnp.stack(wh_s, 0)                # (A, L, H, H)

    # Preferred API: pre-stacked/padded inputs, single (A, B) output.
    def forward_stacked(self, obs, act, batch_tile=None):
        """obs: (A, B, Do_max), act: (A, B, Da_max), zero-padded on features.
        Returns q of shape (A, B)."""
        A, B, _ = obs.shape
        if batch_tile is None:
            TB, B_pad = _choose_tiling(B, self.obs_dim_max, self.act_dim_max)
        else:
            assert batch_tile % _LANE == 0
            assert B <= batch_tile or batch_tile % 1024 == 0
            TB = batch_tile
            B_pad = _round_up(B, TB)
        if B_pad != B:
            obs = jnp.pad(obs, ((0, 0), (0, B_pad - B), (0, 0)))
            act = jnp.pad(act, ((0, 0), (0, B_pad - B), (0, 0)))
        q = critic_forward_fused(obs, act, self.fused,
                                 self.hidden_layer_count, TB)
        return q[:, :B]

    # API-parity wrapper matching the torch module (list in / list of (B,1) out).
    def forward(self, observation_list, action_list):
        Do, Da = self.obs_dim_max, self.act_dim_max
        # zero-pad each agent's obs/act to the shared max dims and stack so a
        # single gridded pallas_call serves every agent (padded lanes hit
        # zero-padded weight rows, contributing exactly 0).
        obs = jnp.stack([
            jnp.pad(o.astype(jnp.float32), ((0, 0), (0, Do - o.shape[-1])))
            for o in observation_list], axis=0)
        act = jnp.stack([
            jnp.pad(a.astype(jnp.float32), ((0, 0), (0, Da - a.shape[-1])))
            for a in action_list], axis=0)
        q_all = self.forward_stacked(obs, act)                 # (A, B)
        # TODO(synk): callers that can consume (A, B) directly should use
        # forward_stacked() and skip these A small output slices.
        return [q_all[i][:, None] for i in range(self.agent_count)]


def _reference_forward(model, observation_list, action_list):
    """Plain-JAX reference of the original CriticDNN math."""
    q_list = []
    for i in range(model.agent_count):
        p = model.params[i]
        x = jnp.concatenate([observation_list[i], action_list[i]],
                            axis=-1).astype(jnp.float32)
        h = jnp.maximum(x @ p["w0"] + p["b0"], 0.0)
        for j in range(model.hidden_layer_count):
            h = jnp.maximum(h @ p["wh"][j] + p["bh"][j], 0.0)
        q_list.append(h @ p["wq"] + p["bq"])
    return q_list


if __name__ == "__main__":
    root = jax.random.PRNGKey(0)
    k_param, k_obs, k_act, k_param2, k_obs2, k_act2 = jax.random.split(root, 6)

    # ---- Test 1: small config, hidden layers, list API parity ---------------
    agent_count = 3
    observation_dim_list = [10, 12, 8]
    action_dim_list = [4, 3, 5]
    hidden_dim = 32
    hidden_layer_count = 2
    batch = 2

    model = CriticDNNPallas(agent_count, observation_dim_list, action_dim_list,
                            hidden_dim, hidden_layer_count, k_param)

    obs_keys = jax.random.split(k_obs, agent_count)
    act_keys = jax.random.split(k_act, agent_count)
    observation_list = [
        jax.random.normal(obs_keys[i], (batch, observation_dim_list[i]),
                          jnp.float32)
        for i in range(agent_count)
    ]
    action_list = [
        jax.random.normal(act_keys[i], (batch, action_dim_list[i]), jnp.float32)
        for i in range(agent_count)
    ]

    q_list = model.forward(observation_list, action_list)
    q_list = [jax.block_until_ready(q) for q in q_list]

    q_ref = _reference_forward(model, observation_list, action_list)
    for q, r in zip(q_list, q_ref):
        assert q.shape == (batch, 1), q.shape
        assert jnp.allclose(q, r, atol=1e-4, rtol=1e-4), (q, r)

    # ---- Test 2: no hidden layers, multi-batch-tile grid + batch padding ----
    agent_count2 = 2
    observation_dim_list2 = [6, 9]
    action_dim_list2 = [2, 4]
    hidden_dim2 = 32
    hidden_layer_count2 = 0
    batch2 = 2100          # pads to 3072 rows -> 3 batch tiles of 1024

    model2 = CriticDNNPallas(agent_count2, observation_dim_list2,
                             action_dim_list2, hidden_dim2,
                             hidden_layer_count2, k_param2)

    obs_keys2 = jax.random.split(k_obs2, agent_count2)
    act_keys2 = jax.random.split(k_act2, agent_count2)
    observation_list2 = [
        jax.random.normal(obs_keys2[i], (batch2, observation_dim_list2[i]),
                          jnp.float32)
        for i in range(agent_count2)
    ]
    action_list2 = [
        jax.random.normal(act_keys2[i], (batch2, action_dim_list2[i]),
                          jnp.float32)
        for i in range(agent_count2)
    ]

    Do2, Da2 = model2.obs_dim_max, model2.act_dim_max
    obs2 = jnp.stack([jnp.pad(o, ((0, 0), (0, Do2 - o.shape[-1])))
                      for o in observation_list2], axis=0)
    act2 = jnp.stack([jnp.pad(a, ((0, 0), (0, Da2 - a.shape[-1])))
                      for a in action_list2], axis=0)
    q2 = jax.block_until_ready(
        model2.forward_stacked(obs2, act2, batch_tile=1024))   # (A, B)
    assert q2.shape == (agent_count2, batch2), q2.shape

    q2_ref = _reference_forward(model2, observation_list2, action_list2)
    for i in range(agent_count2):
        assert jnp.allclose(q2[i], q2_ref[i][:, 0], atol=1e-4, rtol=1e-4)

    print("KERNEL_OK")
</pallas_src>

<mosaic_0001>
module attributes {stable_mosaic.version = 11 : i64} {
  func.func @kernel(%arg0: i32, %arg1: i32, %arg2: memref<1x128x12xf32, #tpu.memory_space<vmem>>, %arg3: memref<1x128x5xf32, #tpu.memory_space<vmem>>, %arg4: memref<1x12x32xf32, #tpu.memory_space<vmem>>, %arg5: memref<1x5x32xf32, #tpu.memory_space<vmem>>, %arg6: memref<1x5x32xf32, #tpu.memory_space<vmem>>, %arg7: memref<1x2x32x32xf32, #tpu.memory_space<vmem>>, %arg8: memref<1x1x128xf32, #tpu.memory_space<vmem>>) attributes {dimension_semantics = [#tpu.dimension_semantics<parallel>, #tpu.dimension_semantics<arbitrary>], iteration_bounds = array<i64: 3, 1>, scalar_prefetch = 0 : i64, scratch_operands = 0 : i64, tpu.core_type = #tpu.core_type<tc>, window_params = [{transform_indices = @transform_0, window_bounds = array<i64: 1, 128, 12>}, {transform_indices = @transform_1, window_bounds = array<i64: 1, 128, 5>}, {transform_indices = @transform_2, window_bounds = array<i64: 1, 12, 32>}, {transform_indices = @transform_3, window_bounds = array<i64: 1, 5, 32>}, {transform_indices = @transform_4, window_bounds = array<i64: 1, 5, 32>}, {transform_indices = @transform_5, window_bounds = array<i64: 1, 2, 32, 32>}, {transform_indices = @transform_6, window_bounds = array<i64: 1, 1, 128>}]} {
    %c0 = arith.constant 0 : index
    %c0_0 = arith.constant 0 : index
    %c0_1 = arith.constant 0 : index
    %0 = vector.load %arg6[%c0, %c0_0, %c0_1] : memref<1x5x32xf32, #tpu.memory_space<vmem>>, vector<1x1x32xf32>
    %1 = vector.shape_cast %0 : vector<1x1x32xf32> to vector<1x32xf32>
    %c0_2 = arith.constant 0 : index
    %c1 = arith.constant 1 : index
    %c0_3 = arith.constant 0 : index
    %2 = vector.load %arg6[%c0_2, %c1, %c0_3] : memref<1x5x32xf32, #tpu.memory_space<vmem>>, vector<1x1x32xf32>
    %3 = vector.shape_cast %2 : vector<1x1x32xf32> to vector<1x32xf32>
    %c0_4 = arith.constant 0 : index
    %c2 = arith.constant 2 : index
    %c0_5 = arith.constant 0 : index
    %4 = vector.load %arg6[%c0_4, %c2, %c0_5] : memref<1x5x32xf32, #tpu.memory_space<vmem>>, vector<1x1x1xf32>
    %5 = vector.shape_cast %4 : vector<1x1x1xf32> to vector<1x1xf32>
    %c0_6 = arith.constant 0 : index
    %c0_7 = arith.constant 0 : index
    %c0_8 = arith.constant 0 : index
    %6 = vector.load %arg2[%c0_6, %c0_7, %c0_8] : memref<1x128x12xf32, #tpu.memory_space<vmem>>, vector<1x128x12xf32>
    %7 = vector.shape_cast %6 : vector<1x128x12xf32> to vector<128x12xf32>
    %c0_9 = arith.constant 0 : index
    %c0_10 = arith.constant 0 : index
    %c0_11 = arith.constant 0 : index
    %8 = vector.load %arg4[%c0_9, %c0_10, %c0_11] : memref<1x12x32xf32, #tpu.memory_space<vmem>>, vector<1x12x32xf32>
    %9 = vector.shape_cast %8 : vector<1x12x32xf32> to vector<12x32xf32>
    %cst = arith.constant dense<0.000000e+00> : vector<128x32xf32>
    %10 = tpu.matmul %7, %9, %cst {dimension_numbers = #tpu.dot_dimension_numbers<[1], [0], [0], [1], [0, 0, 1, 1], [], []>} : vector<128x12xf32>, vector<12x32xf32>, vector<128x32xf32> -> vector<128x32xf32>
    %c0_12 = arith.constant 0 : index
    %c0_13 = arith.constant 0 : index
    %c0_14 = arith.constant 0 : index
    %11 = vector.load %arg3[%c0_12, %c0_13, %c0_14] : memref<1x128x5xf32, #tpu.memory_space<vmem>>, vector<1x128x5xf32>
    %12 = vector.shape_cast %11 : vector<1x128x5xf32> to vector<128x5xf32>
    %c0_15 = arith.constant 0 : index
    %c0_16 = arith.constant 0 : index
    %c0_17 = arith.constant 0 : index
    %13 = vector.load %arg5[%c0_15, %c0_16, %c0_17] : memref<1x5x32xf32, #tpu.memory_space<vmem>>, vector<1x5x32xf32>
    %14 = vector.shape_cast %13 : vector<1x5x32xf32> to vector<5x32xf32>
    %cst_18 = arith.constant dense<0.000000e+00> : vector<128x32xf32>
    %15 = tpu.matmul %12, %14, %cst_18 {dimension_numbers = #tpu.dot_dimension_numbers<[1], [0], [0], [1], [0, 0, 1, 1], [], []>} : vector<128x5xf32>, vector<5x32xf32>, vector<128x32xf32> -> vector<128x32xf32>
    %16 = arith.addf %10, %15 : vector<128x32xf32>
    %17 = vector.broadcast %1 : vector<1x32xf32> to vector<128x32xf32>
    %18 = arith.addf %16, %17 : vector<128x32xf32>
    %cst_19 = arith.constant 0.000000e+00 : f32
    %19 = vector.broadcast %cst_19 : f32 to vector<128x32xf32>
    %20 = arith.maximumf %18, %19 : vector<128x32xf32>
    %c0_20 = arith.constant 0 : index
    %c0_21 = arith.constant 0 : index
    %c0_22 = arith.constant 0 : index
    %c0_23 = arith.constant 0 : index
    %21 = vector.load %arg7[%c0_20, %c0_21, %c0_22, %c0_23] : memref<1x2x32x32xf32, #tpu.memory_space<vmem>>, vector<1x1x32x32xf32>
    %22 = vector.shape_cast %21 : vector<1x1x32x32xf32> to vector<32x32xf32>
    %cst_24 = arith.constant dense<0.000000e+00> : vector<128x32xf32>
    %23 = tpu.matmul %20, %22, %cst_24 {dimension_numbers = #tpu.dot_dimension_numbers<[1], [0], [0], [1], [0, 0, 1, 1], [], []>} : vector<128x32xf32>, vector<32x32xf32>, vector<128x32xf32> -> vector<128x32xf32>
    %c0_25 = arith.constant 0 : index
    %c3 = arith.constant 3 : index
    %c0_26 = arith.constant 0 : index
    %24 = vector.load %arg6[%c0_25, %c3, %c0_26] : memref<1x5x32xf32, #tpu.memory_space<vmem>>, vector<1x1x32xf32>
    %25 = vector.shape_cast %24 : vector<1x1x32xf32> to vector<1x32xf32>
    %26 = vector.broadcast %25 : vector<1x32xf32> to vector<128x32xf32>
    %27 = arith.addf %23, %26 : vector<128x32xf32>
    %cst_27 = arith.constant 0.000000e+00 : f32
    %28 = vector.broadcast %cst_27 : f32 to vector<128x32xf32>
    %29 = arith.maximumf %27, %28 : vector<128x32xf32>
    %c0_28 = arith.constant 0 : index
    %c1_29 = arith.constant 1 : index
    %c0_30 = arith.constant 0 : index
    %c0_31 = arith.constant 0 : index
    %30 = vector.load %arg7[%c0_28, %c1_29, %c0_30, %c0_31] : memref<1x2x32x32xf32, #tpu.memory_space<vmem>>, vector<1x1x32x32xf32>
    %31 = vector.shape_cast %30 : vector<1x1x32x32xf32> to vector<32x32xf32>
    %cst_32 = arith.constant dense<0.000000e+00> : vector<128x32xf32>
    %32 = tpu.matmul %29, %31, %cst_32 {dimension_numbers = #tpu.dot_dimension_numbers<[1], [0], [0], [1], [0, 0, 1, 1], [], []>} : vector<128x32xf32>, vector<32x32xf32>, vector<128x32xf32> -> vector<128x32xf32>
    %c0_33 = arith.constant 0 : index
    %c4 = arith.constant 4 : index
    %c0_34 = arith.constant 0 : index
    %33 = vector.load %arg6[%c0_33, %c4, %c0_34] : memref<1x5x32xf32, #tpu.memory_space<vmem>>, vector<1x1x32xf32>
    %34 = vector.shape_cast %33 : vector<1x1x32xf32> to vector<1x32xf32>
    %35 = vector.broadcast %34 : vector<1x32xf32> to vector<128x32xf32>
    %36 = arith.addf %32, %35 : vector<128x32xf32>
    %cst_35 = arith.constant 0.000000e+00 : f32
    %37 = vector.broadcast %cst_35 : f32 to vector<128x32xf32>
    %38 = arith.maximumf %36, %37 : vector<128x32xf32>
    %39 = vector.shape_cast %38 : vector<128x32xf32> to vector<1x128x32xf32>
    %40 = vector.shape_cast %3 : vector<1x32xf32> to vector<1x1x32xf32>
    %41 = vector.broadcast %40 : vector<1x1x32xf32> to vector<1x128x32xf32>
    %42 = arith.mulf %39, %41 : vector<1x128x32xf32>
    %cst_36 = arith.constant dense<0.000000e+00> : vector<1x128xf32>
    %43 = vector.multi_reduction <add>, %42, %cst_36 [2] : vector<1x128x32xf32> to vector<1x128xf32>
    %44 = vector.broadcast %5 : vector<1x1xf32> to vector<1x128xf32>
    %45 = arith.addf %43, %44 : vector<1x128xf32>
    %c0_37 = arith.constant 0 : index
    %c0_38 = arith.constant 0 : index
    %c0_39 = arith.constant 0 : index
    %46 = vector.load %arg8[%c0_37, %c0_38, %c0_39] : memref<1x1x128xf32, #tpu.memory_space<vmem>>, vector<1x1x128xf32>
    %47 = vector.shape_cast %46 : vector<1x1x128xf32> to vector<1x128xf32>
    %48 = vector.shape_cast %45 : vector<1x128xf32> to vector<1x1x128xf32>
    tpu.vector_store %arg8[%c0_37, %c0_38, %c0_39], %48 {strides = array<i32>} : memref<1x1x128xf32, #tpu.memory_space<vmem>>, vector<1x1x128xf32>,
    return
  }
  func.func @transform_0(%arg0: i32, %arg1: i32) -> (i32, i32, i32) {
    %c0_i32 = arith.constant 0 : i32
    %c0_i32_0 = arith.constant 0 : i32
    return %arg0, %arg1, %c0_i32 : i32, i32, i32
  }
  func.func @transform_1(%arg0: i32, %arg1: i32) -> (i32, i32, i32) {
    %c0_i32 = arith.constant 0 : i32
    %c0_i32_0 = arith.constant 0 : i32
    return %arg0, %arg1, %c0_i32 : i32, i32, i32
  }
  func.func @transform_2(%arg0: i32, %arg1: i32) -> (i32, i32, i32) {
    %c0_i32 = arith.constant 0 : i32
    %c0_i32_0 = arith.constant 0 : i32
    %c0_i32_1 = arith.constant 0 : i32
    return %arg0, %c0_i32, %c0_i32_0 : i32, i32, i32
  }
  func.func @transform_3(%arg0: i32, %arg1: i32) -> (i32, i32, i32) {
    %c0_i32 = arith.constant 0 : i32
    %c0_i32_0 = arith.constant 0 : i32
    %c0_i32_1 = arith.constant 0 : i32
    return %arg0, %c0_i32, %c0_i32_0 : i32, i32, i32
  }
  func.func @transform_4(%arg0: i32, %arg1: i32) -> (i32, i32, i32) {
    %c0_i32 = arith.constant 0 : i32
    %c0_i32_0 = arith.constant 0 : i32
    %c0_i32_1 = arith.constant 0 : i32
    return %arg0, %c0_i32, %c0_i32_0 : i32, i32, i32
  }
  func.func @transform_5(%arg0: i32, %arg1: i32) -> (i32, i32, i32, i32) {
    %c0_i32 = arith.constant 0 : i32
    %c0_i32_0 = arith.constant 0 : i32
    %c0_i32_1 = arith.constant 0 : i32
    %c0_i32_2 = arith.constant 0 : i32
    return %arg0, %c0_i32, %c0_i32_0, %c0_i32_1 : i32, i32, i32, i32
  }
  func.func @transform_6(%arg0: i32, %arg1: i32) -> (i32, i32, i32) {
    %c0_i32 = arith.constant 0 : i32
    %c0_i32_0 = arith.constant 0 : i32
    return %arg0, %arg1, %c0_i32 : i32, i32, i32
  }
}

</mosaic_0001>

<bundles_post_ra>
// kernel: tpu_custom_call.1
= control target key start
LH: loop header
LB: loop body
LE: loop exit
PB: predicated region body
PF: predicated region fallthrough
CT: control target
= control target key end

     0   :  { %11 = vsyncpa [#allocation3], 0  ;;  %s1931_s0 = inlined_call_operand.vmem [shape: f32[3,128,12], index: 0, kind: input, shape index: {}]   ;;  %s1932_s1 = inlined_call_operand.vmem [shape: f32[3,128,5], index: 1, kind: input, shape index: {}]   ;;  %s1933_s2 = inlined_call_operand.vmem [shape: f32[3,12,32], index: 2, kind: input, shape index: {}]   ;;  %s1934_s3 = inlined_call_operand.vmem [shape: f32[3,5,32], index: 3, kind: input, shape index: {}]   ;;  %s1935_s4 = inlined_call_operand.vmem [shape: f32[3,5,32], index: 4, kind: input, shape index: {}]   ;;  %s1936_s5 = inlined_call_operand.vmem [shape: f32[3,2,32,32], index: 5, kind: input, shape index: {}]   ;;  %s1937_s6 = inlined_call_operand.hbm [shape: f32[3,1,128], index: 6, kind: output, shape index: {}]  }
   0x1   :  { %13 = vsyncpa [#allocation3 + $0x1], 0  ;;  %s1604_s21 = smov 0   ;;  %s1606_s22 = smov 0  }
   0x2   :  { %s1608_s23 = smov 0   ;;  %s1610_s24 = smov 0  }
   0x3   :  { %s1612_s25 = smov 0   ;;  %s1614_s26 = smov 0  }
   0x4 LB: > { %s1334_s27 = sadd.s32 4294967295, %s1566_s26   ;;  %s1335_s28 = sadd.s32 4294967294, %s1566_s26   ;;  %s1566_s26 = sphi %s1614_s26, %s19_s26   ;;  %s1562_s25 = sphi %s1612_s25, %s1944_s25   ;;  %s1558_s24 = sphi %s1610_s24, %s1943_s24   ;;  %s1554_s23 = sphi %s1608_s23, %s1942_s23   ;;  %s1550_s22 = sphi %s1606_s22, %s1941_s22   ;;  %s1546_s21 = sphi %s1604_s21, %s1940_s21  }
   0x5   : > { %s31_s29 = sadd.s32 1, %s1562_s25  ;;  %s200_s30 = sadd.s32 1, %s1554_s23 }
   0x6   : > { %p33_p0 = scmp.ge.s32.totalorder %s31_s29, 3  ;;  %p210_p1 = scmp.ne.s32.totalorder %s1554_s23, %s1550_s22 }
   0x7   : > { %p211_p2 = scmp.eq.s32.totalorder %s1334_s27, 2  ;;  %p216_p3 = scmp.ne.s32.totalorder %s1550_s22, %s1546_s21 }
   0x8   : > { %s1946_s29 = smov (%p33_p0, %s31_s29), 0  ;;  %p217_p5 = scmp.eq.s32.totalorder %s1335_s28, 2 }
   0x9   : > { %p1644_p4 = por %p211_p2, %p210_p1  ;;  %s195_s8 = ssub.s32 %s1562_s25, %s1946_s29 }
   0xa   : > { %p1338_p6 = scmp.ge.s32.totalorder %s1566_s26, 1  ;;  %p198_p7 = scmp.eq.s32.totalorder %s195_s8, 0 }
   0xb   : > { %p1651_p8 = por %p217_p5, %p216_p3  ;;  %p291_p9 = scmp.lt.s32.totalorder %s1566_s26, 4 }
   0xc   : > { %s1657_s10 = scalar_select %p198_p7, %s1554_s23, %s200_s30  }
   0xd   : > { %p292_p10 = pnand %p1338_p6, %p291_p9 }
   0xe   : > { %p352_p11 = scmp.lt.s32.totalorder (!%p292_p10), %s1558_s24, 2  ;;  %s1508_s20 = scalar_lea.hbm (!%p292_p10), %s1937_s6, 3 }
   0xf   : > { %295 = sbr.rel (%p292_p10) target bundleno = 788 (0x314), region = 44 }
  0x14   : > { %s1661_s11 = scalar_select %p352_p11, %s1558_s24, 2  ;;  %vm594_vm0 = vcmask 1043456   ;;  %vm476_vm1 = vcmask 1044480   ;;  %vm427_vm2 = vcmask 39936   ;;  %vm545_vm3 = vcmask 97280  }
  0x15   : > { %vm702_vm4 = vcmask 261120   ;;  %vm1124_vm5 = vcmask 130112   ;;  %vm1128_vm6 = vcmask 195712   ;;  %vm1132_vm7 = vcmask 261312  }
  0x16   : > { %s1421_s12 = sshll.u32 %s1661_s11, 7  ;;  %s1423_s13 = sshll.u32 %s1661_s11, 4  ;;  %vm1136_vm8 = vcmask 326912   ;;  %vm1140_vm9 = vcmask 392512   ;;  %vm1144_vm10 = vcmask 458112   ;;  %vm1148_vm11 = vcmask 523712  }
  0x17   : > { %s1668_s16 = scalar_lea.vmem %s1931_s0, %s1421_s12  ;;  %s1673_s19 = scalar_lea.vmem %s1932_s1, %s1421_s12  ;;  %vm1152_vm12 = vcmask 589312   ;;  %vm1156_vm13 = vcmask 654912   ;;  %vm1160_vm14 = vcmask 720512   ;;  %vm1164_vm15 = vcmask 786112  }
  0x18   : > { %s375_s28 = scalar_lea.vmem %s1933_s2, %s1423_s13  ;;  %s1345_s30 = sshll.u32 %s1661_s11, 3  ;;  %v410_v0 = vld [vmem:[%s1673_s19] sm:$0xff]  ;;  %v411_v5 = vld [vmem:[%s1673_s19 + $0x8] sm:$0xff]  ;;  %v412_v7 = vld [vmem:[%s1673_s19 + $0x10] sm:$0xff] }
  0x19   : > { %v409_v1 = vld [vmem:[%s375_s28 + $0x8] sm:$0xf]  ;;  %s379_s15 = scalar_lea.vmem %s1934_s3, %s1345_s30  ;;  %s1686_s12 = scalar_lea.vmem %s1935_s4, %s1345_s30  ;;  %v408_v2 = vld [vmem:[%s375_s28] sm:$0xff]  ;;  %v394_v8 = vld [vmem:[%s1668_s16 + $0x10] sm:$0xff] }
  0x1a   : > { %v392_v3 = vld [vmem:[%s1668_s16] sm:$0xff]  ;;  %1366 = vmatpush.msk.msra.mxu1 %vm594_vm0, %v409_v1  ;;  %v393_v6 = vld [vmem:[%s1668_s16 + $0x8] sm:$0xff]  ;;  %v413_v9 = vld [vmem:[%s1673_s19 + $0x18] sm:$0xff]  ;;  %s1424_s13 = sshll.u32 %s1661_s11, 6  ;;  %s349_s11 = sand.u32 1, %s1550_s22   ;;  %vm1168_vm0 = vcmask 851712  }
  0x1b   : > { %v426_v4 = vld [vmem:[%s379_s15] sm:$0x1f]  ;;  %v395_v10 = vld [vmem:[%s1668_s16 + $0x18] sm:$0xff]  ;;  %v415_v13 = vld [vmem:[%s1673_s19 + $0x28] sm:$0xff]  ;;  %s1739_s28 = scalar_lea.vmem %s1936_s5, %s1424_s13  ;;  %s1194_s30 = scalar_lea.hbm %s1937_s6, %s1558_s24 }
  0x1c   : > { %1349 = vmatpush.msk.msra.mxu0 %vm476_vm1, %v426_v4  ;;  %613 = vmatpush.msra.mxu1 %v408_v2  ;;  %v414_v11 = vld [vmem:[%s1673_s19 + $0x20] sm:$0xff]  ;;  %v397_v14 = vld [vmem:[%s1668_s16 + $0x28] sm:$0xff]  ;;  %v416_v15 = vld [vmem:[%s1673_s19 + $0x30] sm:$0xff]  ;;  %vm1172_vm1 = vcmask 917312   ;;  %s350_s8 = scalar_lea.vmem [#allocation2], %s349_s11  ;;  %s1198_s15 = sshll.u32 %s1194_s30, 4  ;;  %s1199_s15 = int_to_ptr.hbm [resolvable:$true] %s1198_s15 }
  0x1d   : > { %1350 = vmatmul.msk.f32.vlgmr.msra.gmra.mxu0 %vm427_vm2, %v410_v0  ;;  %1367 = vmatmul.msk.f32.vlgmr.msra.gmra.mxu1 %vm545_vm3, %v392_v3  ;;  %v396_v12 = vld [vmem:[%s1668_s16 + $0x20] sm:$0xff]  ;;  %v398_v16 = vld [vmem:[%s1668_s16 + $0x30] sm:$0xff]  ;;  %v417_v17 = vld [vmem:[%s1673_s19 + $0x38] sm:$0xff]  ;;  %s1196_s14 = sshll.u32 %s350_s8, 4  ;;  %s1185_s24 = scalar_lea.sflag [#allocation3], %s349_s11  ;;  %s1197_s14 = int_to_ptr.vmem [resolvable:$true] %s1196_s14 }
  0x1e   : > { %v399_v18 = vld [vmem:[%s1668_s16 + $0x38] sm:$0xff]  ;;  %v418_v19 = vld [vmem:[%s1673_s19 + $0x40] sm:$0xff]  ;;  %v419_v21 = vld [vmem:[%s1673_s19 + $0x48] sm:$0xff]  ;;  %s1502_s17 = sshra.s32 %s1199_s15, 4  ;;  %s1503_s17 = int_to_ptr.hbm [resolvable:$true] %s1502_s17 }
  0x1f   : > { %v400_v20 = vld [vmem:[%s1668_s16 + $0x40] sm:$0xff]  ;;  %v401_v22 = vld [vmem:[%s1668_s16 + $0x48] sm:$0xff]  ;;  %v420_v23 = vld [vmem:[%s1673_s19 + $0x50] sm:$0xff]  ;;  %s1504_s18 = scalar_lea.hbm %s1503_s17, 1  ;;  %p1509_p1 = scmp.lt.s32.totalorder %s1503_s17, %s1937_s6 }
  0x20   : > { %v402_v24 = vld [vmem:[%s1668_s16 + $0x50] sm:$0xff]  ;;  %v421_v25 = vld [vmem:[%s1673_s19 + $0x58] sm:$0xff]  ;;  %v422_v27 = vld [vmem:[%s1673_s19 + $0x60] sm:$0xff]  ;;  %p1505_p12 = scmp.ne.s32.totalorder %s1503_s17, %s1504_s18  ;;  %p1510_p2 = scmp.lt.s32.totalorder %s1508_s20, %s1504_s18 }
  0x21   : > { %v403_v26 = vld [vmem:[%s1668_s16 + $0x58] sm:$0xff]  ;;  %v404_v29 = vld [vmem:[%s1668_s16 + $0x60] sm:$0xff]  ;;  %v698_v30 = vld [vmem:[%s1739_s28 + $0x10] sm:$0xff] }
  0x22   : > { %v699_v28 = vld [vmem:[%s1739_s28 + $0x18] sm:$0xff]  ;;  %v697_v31 = vld [vmem:[%s1739_s28 + $0x8] sm:$0xff]  ;;  %v696_v32 = vld [vmem:[%s1739_s28] sm:$0xff]  ;;  %p1506_p13 = pnand %p1505_p12, %p1644_p4  ;;  %p1511_p3 = por %p1510_p2, %p1509_p1 }
  0x23   : > { %763 = vmatpush.msra.mxu2 %v699_v28  ;;  %v423_v33 = vld [vmem:[%s1673_s19 + $0x68] sm:$0xff]  ;;  %v424_v35 = vld [vmem:[%s1673_s19 + $0x70] sm:$0xff]  ;;  %v425_v37 = vld [vmem:[%s1673_s19 + $0x78] sm:$0xff] }
  0x24   : > { %v405_v34 = vld [vmem:[%s1668_s16 + $0x68] sm:$0xff]  ;;  %v406_v36 = vld [vmem:[%s1668_s16 + $0x70] sm:$0xff]  ;;  %v407_v38 = vld [vmem:[%s1668_s16 + $0x78] sm:$0xff]  ;;  %p1507_p0 = pneg %p1506_p13 }
  0x25   : > { %1351 = vmatmul.msk.f32.gmra.mxu0 %vm427_vm2, %v411_v5  ;;  %1368 = vmatmul.msk.f32.gmra.mxu1 %vm545_vm3, %v393_v6  ;;  %v1762_v39 = vld [vmem:[%s1686_s12] ss:$0 sm:$0xff] }
  0x26   : > { %764 = vmatpush.msra.mxu2 %v698_v30  ;;  %p1512_p5 = pnand %p1511_p3, %p1507_p0 }
  0x28   : > { %765 = vmatpush.msra.mxu2 %v697_v31 }
  0x2a   : > { %766 = vmatpush.msra.mxu2 %v696_v32 }
  0x2d   : > { %1352 = vmatmul.msk.f32.gmra.mxu0 %vm427_vm2, %v412_v7  ;;  %1369 = vmatmul.msk.f32.gmra.mxu1 %vm545_vm3, %v394_v8 }
  0x35   : > { %1353 = vmatmul.msk.f32.gmra.mxu0 %vm427_vm2, %v413_v9  ;;  %1370 = vmatmul.msk.f32.gmra.mxu1 %vm545_vm3, %v395_v10 }
  0x3d   : > { %1354 = vmatmul.msk.f32.gmra.mxu0 %vm427_vm2, %v414_v11  ;;  %1371 = vmatmul.msk.f32.gmra.mxu1 %vm545_vm3, %v396_v12 }
  0x45   : > { %1355 = vmatmul.msk.f32.gmra.mxu0 %vm427_vm2, %v415_v13  ;;  %1372 = vmatmul.msk.f32.gmra.mxu1 %vm545_vm3, %v397_v14 }
  0x4d   : > { %1356 = vmatmul.msk.f32.gmra.mxu0 %vm427_vm2, %v416_v15  ;;  %1373 = vmatmul.msk.f32.gmra.mxu1 %vm545_vm3, %v398_v16 }
  0x55   : > { %1357 = vmatmul.msk.f32.gmra.mxu0 %vm427_vm2, %v417_v17  ;;  %1374 = vmatmul.msk.f32.gmra.mxu1 %vm545_vm3, %v399_v18 }
  0x5d   : > { %1358 = vmatmul.msk.f32.gmra.mxu0 %vm427_vm2, %v418_v19  ;;  %1375 = vmatmul.msk.f32.gmra.mxu1 %vm545_vm3, %v400_v20 }
  0x65   : > { %1359 = vmatmul.msk.f32.gmra.mxu0 %vm427_vm2, %v419_v21  ;;  %1376 = vmatmul.msk.f32.gmra.mxu1 %vm545_vm3, %v401_v22 }
  0x6d   : > { %1360 = vmatmul.msk.f32.gmra.mxu0 %vm427_vm2, %v420_v23  ;;  %1377 = vmatmul.msk.f32.gmra.mxu1 %vm545_vm3, %v402_v24 }
  0x75   : > { %1361 = vmatmul.msk.f32.gmra.mxu0 %vm427_vm2, %v421_v25  ;;  %1378 = vmatmul.msk.f32.gmra.mxu1 %vm545_vm3, %v403_v26 }
  0x7d   : > { %1362 = vmatmul.msk.f32.gmra.mxu0 %vm427_vm2, %v422_v27  ;;  %1379 = vmatmul.msk.f32.gmra.mxu1 %vm545_vm3, %v404_v29 }
  0x85   : > { %1363 = vmatmul.msk.f32.gmra.mxu0 %vm427_vm2, %v423_v33  ;;  %1380 = vmatmul.msk.f32.gmra.mxu1 %vm545_vm3, %v405_v34 }
  0x8d   : > { %1364 = vmatmul.msk.f32.gmra.mxu0 %vm427_vm2, %v424_v35  ;;  %1381 = vmatmul.msk.f32.gmra.mxu1 %vm545_vm3, %v406_v36 }
  0x95   : > { %1365 = vmatmul.msk.f32.gmra.mxu0 %vm427_vm2, %v425_v37  ;;  %1382 = vmatmul.msk.f32.gmra.mxu1 %vm545_vm3, %v407_v38  ;;  %v1402_v37 = vld [vmem:[%s1739_s28 + $0x38] sm:$0xff]  ;;  %vm1176_vm2 = vcmask 982912   ;;  %vm1180_vm3 = vcmask 1048512  }
  0x96   : > { %899 = vmatpush.msra.mxu3 %v1402_v37 }
  0x9a   : > { %v497_v40 = vpop.f32.mrf.mxu0  ;;  %v615_v41 = vpop.f32.mrf.mxu1 }
  0x9b   : > { %v616_v42 = vadd.f32 %v615_v41, %v497_v40 }
  0x9d   : > { %v664_v43 = vadd.f32 %v1762_v39, %v616_v42 }
  0x9f   : > { %v680_v44 = vmax.f32 %v664_v43, 0.0 }
  0xa1   : > { %1383 = vmatmul.msk.f32.vlgmr.msra.gmra.mxu2 %vm702_vm4, %v680_v44 }
  0xa2   : > { %v500_v45 = vpop.f32.mrf.mxu0  ;;  %v618_v46 = vpop.f32.mrf.mxu1 }
  0xa3   : > { %v619_v47 = vadd.f32 %v618_v46, %v500_v45  ;;  %v1401_v46 = vld [vmem:[%s1739_s28 + $0x30] sm:$0xff] }
  0xa4   : > { %900 = vmatpush.msra.mxu3 %v1401_v46 }
  0xa5   : > { %v665_v48 = vadd.f32 %v1762_v39, %v619_v47 }
  0xa7   : > { %v681_v49 = vmax.f32 %v665_v48, 0.0  ;;  %v1400_v48 = vld [vmem:[%s1739_s28 + $0x28] sm:$0xff] }
  0xa8   : > { %901 = vmatpush.msra.mxu3 %v1400_v48  ;;  %v1837_v48 = vld [vmem:[%s1686_s12 + $0x4] ss:$0 sm:$0xff] }
  0xa9   : > { %1384 = vmatmul.msk.f32.gmra.mxu2 %vm702_vm4, %v681_v49 }
  0xaa   : > { %v503_v50 = vpop.f32.mrf.mxu0  ;;  %v621_v51 = vpop.f32.mrf.mxu1 }
  0xab   : > { %v622_v52 = vadd.f32 %v621_v51, %v503_v50  ;;  %v1399_v50 = vld [vmem:[%s1739_s28 + $0x20] sm:$0xff] }
  0xac   : > { %902 = vmatpush.msra.mxu3 %v1399_v50  ;;  %v1840_v50 = vld [vmem:[%s1686_s12 + $0x1] ss:$0 sm:$0xff] }
  0xad   : > { %v666_v53 = vadd.f32 %v1762_v39, %v622_v52 }
  0xaf   : > { %v682_v54 = vmax.f32 %v666_v53, 0.0 }
  0xb1   : > { %1385 = vmatmul.msk.f32.gmra.mxu2 %vm702_vm4, %v682_v54 }
  0xb2   : > { %v506_v55 = vpop.f32.mrf.mxu0  ;;  %v624_v56 = vpop.f32.mrf.mxu1 }
  0xb3   : > { %v625_v57 = vadd.f32 %v624_v56, %v506_v55 }
  0xb5   : > { %v667_v58 = vadd.f32 %v1762_v39, %v625_v57 }
  0xb7   : > { %v683_v59 = vmax.f32 %v667_v58, 0.0 }
  0xb9   : > { %1386 = vmatmul.msk.f32.gmra.mxu2 %vm702_vm4, %v683_v59 }
  0xba   : > { %v509_v60 = vpop.f32.mrf.mxu0  ;;  %v627_v61 = vpop.f32.mrf.mxu1 }
  0xbb   : > { %v628_v62 = vadd.f32 %v627_v61, %v509_v60  ;;  %v1801_v61 = vld [vmem:[%s1686_s12 + $0x3] ss:$0 sm:$0xff] }
  0xbd   : > { %v668_v63 = vadd.f32 %v1762_v39, %v628_v62 }
  0xbf   : > { %v684_v0 = vmax.f32 %v668_v63, 0.0 }
  0xc1   : > { %1387 = vmatmul.msk.f32.gmra.mxu2 %vm702_vm4, %v684_v0 }
  0xc2   : > { %v512_v1 = vpop.f32.mrf.mxu0  ;;  %v630_v2 = vpop.f32.mrf.mxu1 }
  0xc3   : > { %v631_v3 = vadd.f32 %v630_v2, %v512_v1 }
  0xc5   : > { %v669_v4 = vadd.f32 %v1762_v39, %v631_v3 }
  0xc7   : > { %v685_v5 = vmax.f32 %v669_v4, 0.0 }
  0xc9   : > { %1388 = vmatmul.msk.f32.gmra.mxu2 %vm702_vm4, %v685_v5 }
  0xca   : > { %v515_v6 = vpop.f32.mrf.mxu0  ;;  %v633_v7 = vpop.f32.mrf.mxu1 }
  0xcb   : > { %v634_v8 = vadd.f32 %v633_v7, %v515_v6 }
  0xcd   : > { %v670_v9 = vadd.f32 %v1762_v39, %v634_v8 }
  0xcf   : > { %v686_v10 = vmax.f32 %v670_v9, 0.0 }
  0xd1   : > { %1389 = vmatmul.msk.f32.gmra.mxu2 %vm702_vm4, %v686_v10 }
  0xd2   : > { %v518_v11 = vpop.f32.mrf.mxu0  ;;  %v636_v12 = vpop.f32.mrf.mxu1 }
  0xd3   : > { %v637_v13 = vadd.f32 %v636_v12, %v518_v11 }
  0xd5   : > { %v671_v14 = vadd.f32 %v1762_v39, %v637_v13 }
  0xd7   : > { %v687_v15 = vmax.f32 %v671_v14, 0.0 }
  0xd9   : > { %1390 = vmatmul.msk.f32.gmra.mxu2 %vm702_vm4, %v687_v15 }
  0xda   : > { %v521_v16 = vpop.f32.mrf.mxu0  ;;  %v639_v17 = vpop.f32.mrf.mxu1 }
  0xdb   : > { %v640_v18 = vadd.f32 %v639_v17, %v521_v16 }
  0xdd   : > { %v672_v19 = vadd.f32 %v1762_v39, %v640_v18 }
  0xdf   : > { %v688_v20 = vmax.f32 %v672_v19, 0.0 }
  0xe1   : > { %1391 = vmatmul.msk.f32.gmra.mxu2 %vm702_vm4, %v688_v20 }
  0xe2   : > { %v524_v21 = vpop.f32.mrf.mxu0  ;;  %v642_v22 = vpop.f32.mrf.mxu1 }
  0xe3   : > { %v643_v23 = vadd.f32 %v642_v22, %v524_v21 }
  0xe5   : > { %v673_v24 = vadd.f32 %v1762_v39, %v643_v23 }
  0xe7   : > { %v689_v25 = vmax.f32 %v673_v24, 0.0 }
  0xe9   : > { %1392 = vmatmul.msk.f32.gmra.mxu2 %vm702_vm4, %v689_v25 }
  0xea   : > { %v527_v26 = vpop.f32.mrf.mxu0  ;;  %v645_v27 = vpop.f32.mrf.mxu1 }
  0xeb   : > { %v646_v28 = vadd.f32 %v645_v27, %v527_v26 }
  0xed   : > { %v674_v29 = vadd.f32 %v1762_v39, %v646_v28 }
  0xef   : > { %v690_v30 = vmax.f32 %v674_v29, 0.0 }
  0xf1   : > { %1393 = vmatmul.msk.f32.gmra.mxu2 %vm702_vm4, %v690_v30  ;;  %v1568_v30 = vmov 0  }
  0xf2   : > { %v530_v31 = vpop.f32.mrf.mxu0  ;;  %v648_v32 = vpop.f32.mrf.mxu1  ;;  %1481 = vset.pattern.permute.xlu1 %v1568_v30  ;;  %1482 = vset.pattern.permute.xlu2 %v1568_v30 }
  0xf3   : > { %v649_v33 = vadd.f32 %v648_v32, %v530_v31  ;;  %v391_v31 = vld [vmem:[%s1686_s12 + $0x2] sm:$0x1]  ;;  %1483 = vset.pattern.permute.xlu0 %v1568_v30 }
  0xf4   : > { %1035 = vperm.xlu1 %1481, %v391_v31  }
  0xf5   : > { %v675_v34 = vadd.f32 %v1762_v39, %v649_v33 }
  0xf7   : > { %v691_v35 = vmax.f32 %v675_v34, 0.0 }
  0xf9   : > { %1394 = vmatmul.msk.f32.gmra.mxu2 %vm702_vm4, %v691_v35 }
  0xfa   : > { %v533_v36 = vpop.f32.mrf.mxu0  ;;  %v651_v38 = vpop.f32.mrf.mxu1 }
  0xfb   : > { %v652_v40 = vadd.f32 %v651_v38, %v533_v36 }
  0xfd   : > { %v676_v41 = vadd.f32 %v1762_v39, %v652_v40 }
  0xff   : > { %v692_v42 = vmax.f32 %v676_v41, 0.0 }
 0x101   : > { %1395 = vmatmul.msk.f32.gmra.mxu2 %vm702_vm4, %v692_v42 }
 0x102   : > { %v536_v43 = vpop.f32.mrf.mxu0  ;;  %v654_v44 = vpop.f32.mrf.mxu1 }
 0x103   : > { %v655_v45 = vadd.f32 %v654_v44, %v536_v43 }
 0x105   : > { %v677_v47 = vadd.f32 %v1762_v39, %v655_v45 }
 0x107   : > { %v693_v49 = vmax.f32 %v677_v47, 0.0 }
 0x109   : > { %1396 = vmatmul.msk.f32.gmra.mxu2 %vm702_vm4, %v693_v49 }
 0x10a   : > { %v539_v51 = vpop.f32.mrf.mxu0  ;;  %v657_v52 = vpop.f32.mrf.mxu1 }
 0x10b   : > { %v658_v53 = vadd.f32 %v657_v52, %v539_v51 }
 0x10d   : > { %v678_v54 = vadd.f32 %v1762_v39, %v658_v53 }
 0x10f   : > { %v694_v55 = vmax.f32 %v678_v54, 0.0 }
 0x111   : > { %1397 = vmatmul.msk.f32.gmra.mxu2 %vm702_vm4, %v694_v55 }
 0x112   : > { %v542_v56 = vpop.f32.mrf.mxu0  ;;  %v660_v57 = vpop.f32.mrf.mxu1 }
 0x113   : > { %v661_v58 = vadd.f32 %v660_v57, %v542_v56 }
 0x115   : > { %v679_v59 = vadd.f32 %v1762_v39, %v661_v58 }
 0x117   : > { %v695_v60 = vmax.f32 %v679_v59, 0.0 }
 0x119   : > { %1398 = vmatmul.msk.f32.gmra.mxu2 %vm702_vm4, %v695_v60 }
 0x124   : > { %v768_v62 = vpop.f32.mrf.mxu2 }
 0x125   : > { %v769_v63 = vadd.f32 %v1801_v61, %v768_v62 }
 0x127   : > { %v816_v0 = vmax.f32 %v769_v63, 0.0 }
 0x129   : > { %1403 = vmatmul.msk.f32.vlgmr.msra.gmra.mxu3 %vm702_vm4, %v816_v0 }
 0x12c   : > { %v771_v1 = vpop.f32.mrf.mxu2 }
 0x12d   : > { %v772_v2 = vadd.f32 %v1801_v61, %v771_v1 }
 0x12f   : > { %v817_v3 = vmax.f32 %v772_v2, 0.0 }
 0x131   : > { %1404 = vmatmul.msk.f32.gmra.mxu3 %vm702_vm4, %v817_v3 }
 0x134   : > { %v774_v4 = vpop.f32.mrf.mxu2 }
 0x135   : > { %v775_v39 = vadd.f32 %v1801_v61, %v774_v4 }
 0x137   : > { %v818_v5 = vmax.f32 %v775_v39, 0.0 }
 0x139   : > { %1405 = vmatmul.msk.f32.gmra.mxu3 %vm702_vm4, %v818_v5 }
 0x13c   : > { %v777_v6 = vpop.f32.mrf.mxu2 }
 0x13d   : > { %v778_v7 = vadd.f32 %v1801_v61, %v777_v6 }
 0x13f   : > { %v819_v8 = vmax.f32 %v778_v7, 0.0 }
 0x141   : > { %1406 = vmatmul.msk.f32.gmra.mxu3 %vm702_vm4, %v819_v8 }
 0x144   : > { %v780_v9 = vpop.f32.mrf.mxu2 }
 0x145   : > { %v781_v10 = vadd.f32 %v1801_v61, %v780_v9 }
 0x147   : > { %v820_v11 = vmax.f32 %v781_v10, 0.0 }
 0x149   : > { %1407 = vmatmul.msk.f32.gmra.mxu3 %vm702_vm4, %v820_v11 }
 0x14c   : > { %v783_v12 = vpop.f32.mrf.mxu2 }
 0x14d   : > { %v784_v13 = vadd.f32 %v1801_v61, %v783_v12 }
 0x14f   : > { %v821_v14 = vmax.f32 %v784_v13, 0.0 }
 0x151   : > { %1408 = vmatmul.msk.f32.gmra.mxu3 %vm702_vm4, %v821_v14 }
 0x154   : > { %v786_v15 = vpop.f32.mrf.mxu2 }
 0x155   : > { %v787_v16 = vadd.f32 %v1801_v61, %v786_v15 }
 0x157   : > { %v822_v17 = vmax.f32 %v787_v16, 0.0 }
 0x159   : > { %1409 = vmatmul.msk.f32.gmra.mxu3 %vm702_vm4, %v822_v17 }
 0x15c   : > { %v789_v18 = vpop.f32.mrf.mxu2 }
 0x15d   : > { %v790_v19 = vadd.f32 %v1801_v61, %v789_v18 }
 0x15f   : > { %v823_v20 = vmax.f32 %v790_v19, 0.0 }
 0x161   : > { %1410 = vmatmul.msk.f32.gmra.mxu3 %vm702_vm4, %v823_v20 }
 0x164   : > { %v792_v21 = vpop.f32.mrf.mxu2 }
 0x165   : > { %v793_v22 = vadd.f32 %v1801_v61, %v792_v21 }
 0x167   : > { %v824_v23 = vmax.f32 %v793_v22, 0.0 }
 0x169   : > { %1411 = vmatmul.msk.f32.gmra.mxu3 %vm702_vm4, %v824_v23 }
 0x16c   : > { %v795_v24 = vpop.f32.mrf.mxu2 }
 0x16d   : > { %v796_v25 = vadd.f32 %v1801_v61, %v795_v24 }
 0x16f   : > { %v825_v26 = vmax.f32 %v796_v25, 0.0 }
 0x171   : > { %1412 = vmatmul.msk.f32.gmra.mxu3 %vm702_vm4, %v825_v26 }
 0x174   : > { %v798_v27 = vpop.f32.mrf.mxu2 }
 0x175   : > { %v799_v28 = vadd.f32 %v1801_v61, %v798_v27 }
 0x177   : > { %v826_v29 = vmax.f32 %v799_v28, 0.0 }
 0x179   : > { %1413 = vmatmul.msk.f32.gmra.mxu3 %vm702_vm4, %v826_v29 }
 0x17c   : > { %v801_v32 = vpop.f32.mrf.mxu2 }
 0x17d   : > { %v802_v33 = vadd.f32 %v1801_v61, %v801_v32 }
 0x17f   : > { %v827_v34 = vmax.f32 %v802_v33, 0.0 }
 0x181   : > { %1414 = vmatmul.msk.f32.gmra.mxu3 %vm702_vm4, %v827_v34 }
 0x184   : > { %v804_v35 = vpop.f32.mrf.mxu2 }
 0x185   : > { %v805_v36 = vadd.f32 %v1801_v61, %v804_v35 }
 0x187   : > { %v828_v37 = vmax.f32 %v805_v36, 0.0 }
 0x189   : > { %1415 = vmatmul.msk.f32.gmra.mxu3 %vm702_vm4, %v828_v37 }
 0x18c   : > { %v807_v38 = vpop.f32.mrf.mxu2 }
 0x18d   : > { %v808_v40 = vadd.f32 %v1801_v61, %v807_v38 }
 0x18f   : > { %v829_v41 = vmax.f32 %v808_v40, 0.0 }
 0x191   : > { %1416 = vmatmul.msk.f32.gmra.mxu3 %vm702_vm4, %v829_v41 }
 0x194   : > { %v810_v42 = vpop.f32.mrf.mxu2 }
 0x195   : > { %v811_v43 = vadd.f32 %v1801_v61, %v810_v42 }
 0x197   : > { %v830_v44 = vmax.f32 %v811_v43, 0.0 }
 0x199   : > { %1417 = vmatmul.msk.f32.gmra.mxu3 %vm702_vm4, %v830_v44 }
 0x19c   : > { %v813_v45 = vpop.f32.mrf.mxu2 }
 0x19d   : > { %v814_v46 = vadd.f32 %v1801_v61, %v813_v45 }
 0x19f   : > { %v831_v47 = vmax.f32 %v814_v46, 0.0 }
 0x1a1   : > { %1418 = vmatmul.msk.f32.gmra.mxu3 %vm702_vm4, %v831_v47 }
 0x1ac   : > { %v904_v49 = vpop.f32.mrf.mxu3 }
 0x1ad   : > { %v905_v51 = vadd.f32 %v1837_v48, %v904_v49 }
 0x1af   : > { %v952_v52 = vmax.f32 %v905_v51, 0.0 }
 0x1b1   : > { %v969_v53 = vmul.f32 %v1840_v50, %v952_v52 }
 0x1b3   : > { %v985_v54 = vsel %vm702_vm4, %v969_v53, 0.0 }
 0x1b4   : > { %v907_v55 = vpop.f32.mrf.mxu3  ;;  %986 = vadd.xlane.f32.xlu0 %v985_v54 }
 0x1b5   : > { %v908_v56 = vadd.f32 %v1837_v48, %v907_v55 }
 0x1b7   : > { %v953_v57 = vmax.f32 %v908_v56, 0.0 }
 0x1b9   : > { %v970_v58 = vmul.f32 %v1840_v50, %v953_v57 }
 0x1bb   : > { %v988_v59 = vsel %vm702_vm4, %v970_v58, 0.0 }
 0x1bc   : > { %v910_v60 = vpop.f32.mrf.mxu3  ;;  %989 = vadd.xlane.f32.xlu0 %v988_v59 }
 0x1bd   : > { %v911_v61 = vadd.f32 %v1837_v48, %v910_v60 }
 0x1bf   : > { %v954_v62 = vmax.f32 %v911_v61, 0.0 }
 0x1c1   : > { %v971_v63 = vmul.f32 %v1840_v50, %v954_v62 }
 0x1c3   : > { %v991_v0 = vsel %vm702_vm4, %v971_v63, 0.0 }
 0x1c4   : > { %v913_v1 = vpop.f32.mrf.mxu3  ;;  %992 = vadd.xlane.f32.xlu1 %v991_v0 }
 0x1c5   : > { %v914_v2 = vadd.f32 %v1837_v48, %v913_v1 }
 0x1c7   : > { %v955_v3 = vmax.f32 %v914_v2, 0.0 }
 0x1c9   : > { %v972_v4 = vmul.f32 %v1840_v50, %v955_v3 }
 0x1cb   : > { %v994_v39 = vsel %vm702_vm4, %v972_v4, 0.0  ;;  %v1036_v4 = vpop.permute.xlu1 %1035 }
 0x1cc   : > { %v916_v5 = vpop.f32.mrf.mxu3  ;;  %995 = vadd.xlane.f32.xlu1 %v994_v39 }
 0x1cd   : > { %v917_v6 = vadd.f32 %v1837_v48, %v916_v5  ;;  %v1037_v5 = vperm.slane %v1036_v4, 0 }
 0x1cf   : > { %v956_v7 = vmax.f32 %v917_v6, 0.0 }
 0x1d1   : > { %v973_v8 = vmul.f32 %v1840_v50, %v956_v7 }
 0x1d3   : > { %v997_v9 = vsel %vm702_vm4, %v973_v8, 0.0 }
 0x1d4   : > { %v919_v10 = vpop.f32.mrf.mxu3  ;;  %998 = vadd.xlane.f32.xlu2 %v997_v9 }
 0x1d5   : > { %v920_v11 = vadd.f32 %v1837_v48, %v919_v10 }
 0x1d7   : > { %v957_v12 = vmax.f32 %v920_v11, 0.0 }
 0x1d9   : > { %v974_v13 = vmul.f32 %v1840_v50, %v957_v12 }
 0x1db   : > { %v1000_v14 = vsel %vm702_vm4, %v974_v13, 0.0 }
 0x1dc   : > { %v922_v15 = vpop.f32.mrf.mxu3  ;;  %1001 = vadd.xlane.f32.xlu2 %v1000_v14 }
 0x1dd   : > { %v923_v16 = vadd.f32 %v1837_v48, %v922_v15 }
 0x1df   : > { %v958_v17 = vmax.f32 %v923_v16, 0.0 }
 0x1e1   : > { %v975_v18 = vmul.f32 %v1840_v50, %v958_v17 }
 0x1e3   : > { %v1003_v19 = vsel %vm702_vm4, %v975_v18, 0.0 }
 0x1e4   : > { %v925_v20 = vpop.f32.mrf.mxu3  ;;  %1004 = vadd.xlane.f32.xlu0 %v1003_v19 }
 0x1e5   : > { %v926_v21 = vadd.f32 %v1837_v48, %v925_v20 }
 0x1e7   : > { %v959_v22 = vmax.f32 %v926_v21, 0.0 }
 0x1e9   : > { %v976_v23 = vmul.f32 %v1840_v50, %v959_v22 }
 0x1eb   : > { %v1006_v24 = vsel %vm702_vm4, %v976_v23, 0.0 }
 0x1ec   : > { %v928_v25 = vpop.f32.mrf.mxu3  ;;  %1007 = vadd.xlane.f32.xlu1 %v1006_v24 }
 0x1ed   : > { %v929_v26 = vadd.f32 %v1837_v48, %v928_v25 }
 0x1ef   : > { %v960_v27 = vmax.f32 %v929_v26, 0.0 }
 0x1f1   : > { %v977_v28 = vmul.f32 %v1840_v50, %v960_v27 }
 0x1f3   : > { %v1009_v29 = vsel %vm702_vm4, %v977_v28, 0.0 }
 0x1f4   : > { %v931_v30 = vpop.f32.mrf.mxu3  ;;  %1010 = vadd.xlane.f32.xlu2 %v1009_v29 }
 0x1f5   : > { %v932_v31 = vadd.f32 %v1837_v48, %v931_v30 }
 0x1f7   : > { %v961_v32 = vmax.f32 %v932_v31, 0.0 }
 0x1f9   : > { %v978_v33 = vmul.f32 %v1840_v50, %v961_v32 }
 0x1fb   : > { %v1012_v34 = vsel %vm702_vm4, %v978_v33, 0.0 }
 0x1fc   : > { %v934_v35 = vpop.f32.mrf.mxu3  ;;  %1013 = vadd.xlane.f32.xlu0 %v1012_v34 }
 0x1fd   : > { %v935_v36 = vadd.f32 %v1837_v48, %v934_v35 }
 0x1ff   : > { %v962_v37 = vmax.f32 %v935_v36, 0.0 }
 0x201   : > { %v979_v38 = vmul.f32 %v1840_v50, %v962_v37 }
 0x203   : > { %v1015_v40 = vsel %vm702_vm4, %v979_v38, 0.0  ;;  %v1119_v38 = vlaneseq }
 0x204   : > { %v937_v41 = vpop.f32.mrf.mxu3  ;;  %1016 = vadd.xlane.f32.xlu1 %v1015_v40 }
 0x205   : > { %v938_v42 = vadd.f32 %v1837_v48, %v937_v41  ;;  %v1120_v41 = vand.u32 127, %v1119_v38 }
 0x207   : > { %v963_v43 = vmax.f32 %v938_v42, 0.0  ;;  %v1122_v42 = vadd.s32 4294967288, %v1120_v41 }
 0x209   : > { %v980_v44 = vmul.f32 %v1840_v50, %v963_v43 }
 0x20b   : > { %v1018_v45 = vsel %vm702_vm4, %v980_v44, 0.0 }
 0x20c   : > { %v940_v46 = vpop.f32.mrf.mxu3  ;;  %1019 = vadd.xlane.f32.xlu2 %v1018_v45 }
 0x20d   : > { %v941_v47 = vadd.f32 %v1837_v48, %v940_v46  ;;  %v1126_v46 = vadd.s32 4294967280, %v1120_v41 }
 0x20f   : > { %v964_v49 = vmax.f32 %v941_v47, 0.0 }
 0x211   : > { %v981_v51 = vmul.f32 %v1840_v50, %v964_v49 }
 0x213   : > { %v1021_v52 = vsel %vm702_vm4, %v981_v51, 0.0  ;;  %v1130_v51 = vadd.s32 4294967272, %v1120_v41 }
 0x214   : > { %v943_v53 = vpop.f32.mrf.mxu3  ;;  %1022 = vadd.xlane.f32.xlu0 %v1021_v52 }
 0x215   : > { %v944_v54 = vadd.f32 %v1837_v48, %v943_v53 }
 0x217   : > { %v965_v55 = vmax.f32 %v944_v54, 0.0 }
 0x219   : > { %v982_v56 = vmul.f32 %v1840_v50, %v965_v55 }
 0x21b   : > { %v1024_v57 = vsel %vm702_vm4, %v982_v56, 0.0  ;;  %v1138_v56 = vadd.s32 4294967256, %v1120_v41 }
 0x21c   : > { %v946_v58 = vpop.f32.mrf.mxu3  ;;  %1025 = vadd.xlane.f32.xlu1 %v1024_v57  ;;  %v1134_v57 = vadd.s32 4294967264, %v1120_v41 }
 0x21d   : > { %v947_v59 = vadd.f32 %v1837_v48, %v946_v58 }
 0x21f   : > { %v966_v60 = vmax.f32 %v947_v59, 0.0 }
 0x221   : > { %v983_v61 = vmul.f32 %v1840_v50, %v966_v60 }
 0x223   : > { %v1027_v62 = vsel %vm702_vm4, %v983_v61, 0.0 }
 0x224   : > { %v949_v63 = vpop.f32.mrf.mxu3  ;;  %1028 = vadd.xlane.f32.xlu2 %v1027_v62 }
 0x225   : > { %v950_v0 = vadd.f32 %v1837_v48, %v949_v63  ;;  %v1146_v63 = vadd.s32 4294967240, %v1120_v41 }
 0x227   : > { %v967_v1 = vmax.f32 %v950_v0, 0.0  ;;  %v987_v39 = vpop.xlane.xlu0 %986 }
 0x228   : > { %v1039_v7 = vadd.f32 %v1037_v5, %v987_v39 }
 0x229   : > { %v984_v2 = vmul.f32 %v1840_v50, %v967_v1  ;;  %v1142_v1 = vadd.s32 4294967248, %v1120_v41 }
 0x22b   : > { %v1030_v3 = vsel %vm702_vm4, %v984_v2, 0.0  ;;  %v1150_v2 = vadd.s32 4294967232, %v1120_v41 }
 0x22c   : > { %1031 = vadd.xlane.f32.xlu0 %v1030_v3 }
 0x22f   : > { %v990_v8 = vpop.xlane.xlu0 %989 }
 0x230   : > { %v1040_v9 = vadd.f32 %v1037_v5, %v990_v8  ;;  %v1158_v8 = vadd.s32 4294967216, %v1120_v41 }
 0x237   : > { %v993_v6 = vpop.xlane.xlu1 %992 }
 0x238   : > { %v1041_v12 = vadd.f32 %v1037_v5, %v993_v6 }
 0x23c   : > { %1072 = vperm.xlu2 %1482, %v1039_v7  }
 0x23f   : > { %v996_v10 = vpop.xlane.xlu1 %995 }
 0x240   : > { %v1042_v11 = vadd.f32 %v1037_v5, %v996_v10  ;;  %1075 = vperm.xlu0 %1483, %v1040_v9   ;;  %v1154_v9 = vadd.s32 4294967224, %v1120_v41  ;;  %v1162_v10 = vadd.s32 4294967208, %v1120_v41 }
 0x242   : > { %1081 = vperm.xlu1 %1481, %v1042_v11  }
 0x244   : > { %1078 = vperm.xlu2 %1482, %v1041_v12  }
 0x247   : > { %v999_v48 = vpop.xlane.xlu2 %998 }
 0x248   : > { %v1043_v13 = vadd.f32 %v1037_v5, %v999_v48 }
 0x24c   : > { %1084 = vperm.xlu2 %1482, %v1043_v13  }
 0x24f   : > { %v1002_v50 = vpop.xlane.xlu2 %1001 }
 0x250   : > { %v1044_v14 = vadd.f32 %v1037_v5, %v1002_v50 }
 0x252   : > { %1087 = vperm.xlu1 %1481, %v1044_v14  }
 0x257   : > { %v1005_v15 = vpop.xlane.xlu0 %1004 }
 0x258   : > { %v1045_v16 = vadd.f32 %v1037_v5, %v1005_v15 }
 0x25a   : > { %1090 = vperm.xlu2 %1482, %v1045_v16  }
 0x25f   : > { %v1008_v17 = vpop.xlane.xlu1 %1007 }
 0x260   : > { %v1046_v18 = vadd.f32 %v1037_v5, %v1008_v17  ;;  %v1170_v17 = vadd.s32 4294967192, %v1120_v41 }
 0x262   : > { %1093 = vperm.xlu1 %1481, %v1046_v18   ;;  %v1166_v18 = vadd.s32 4294967200, %v1120_v41 }
 0x267   : > { %v1011_v19 = vpop.xlane.xlu2 %1010 }
 0x268   : > { %v1047_v20 = vadd.f32 %v1037_v5, %v1011_v19 }
 0x26a   : > { %1096 = vperm.xlu0 %1483, %v1047_v20  }
 0x26f   : > { %v1014_v21 = vpop.xlane.xlu0 %1013 }
 0x270   : > { %v1048_v22 = vadd.f32 %v1037_v5, %v1014_v21 }
 0x272   : > { %1099 = vperm.xlu2 %1482, %v1048_v22   ;;  %v1174_v22 = vadd.s32 4294967184, %v1120_v41 }
 0x277   : > { %v1017_v23 = vpop.xlane.xlu1 %1016 }
 0x278   : > { %v1049_v24 = vadd.f32 %v1037_v5, %v1017_v23 }
 0x27a   : > { %1102 = vperm.xlu1 %1481, %v1049_v24   ;;  %v1178_v24 = vadd.s32 4294967176, %v1120_v41 }
 0x27f   : > { %v1020_v25 = vpop.xlane.xlu2 %1019 }
 0x280   : > { %v1050_v26 = vadd.f32 %v1037_v5, %v1020_v25 }
 0x282   : > { %1105 = vperm.xlu0 %1483, %v1050_v26  }
 0x287   : > { %v1023_v27 = vpop.xlane.xlu0 %1022 }
 0x288   : > { %v1051_v28 = vadd.f32 %v1037_v5, %v1023_v27 }
 0x28a   : > { %1108 = vperm.xlu2 %1482, %v1051_v28  }
 0x28f   : > { %v1026_v29 = vpop.xlane.xlu1 %1025 }
 0x290   : > { %v1052_v30 = vadd.f32 %v1037_v5, %v1026_v29 }
 0x292   : > { %1111 = vperm.xlu1 %1481, %v1052_v30  }
 0x297   : > { %v1029_v31 = vpop.xlane.xlu2 %1028 }
 0x298   : > { %v1053_v32 = vadd.f32 %v1037_v5, %v1029_v31 }
 0x29a   : > { %1114 = vperm.xlu0 %1483, %v1053_v32  }
 0x29f   : > { %v1032_v33 = vpop.xlane.xlu0 %1031  ;;  %v1073_v35 = vpop.permute.xlu2 %1072 }
 0x2a0   : > { %v1054_v34 = vadd.f32 %v1037_v5, %v1032_v33  ;;  %v1121_v49 = vperm.slane %v1073_v35, %v1120_v41 }
 0x2a2   : > { %1117 = vperm.xlu2 %1482, %v1054_v34  }
 0x2a7   : > { %v1079_v36 = vpop.permute.xlu2 %1078 }
 0x2a8   : > { %v1127_v53 = vperm.slane %v1079_v36, %v1126_v46 }
 0x2af   : > { %v1085_v40 = vpop.permute.xlu2 %1084 }
 0x2b0   : > { %v1135_v0 = vperm.slane %v1085_v40, %v1134_v57 }
 0x2b2   : > { %v1076_v43 = vpop.permute.xlu0 %1075 }
 0x2b3   : > { %v1123_v45 = vperm.slane %v1076_v43, %v1122_v42 }
 0x2b4   : > { %v1082_v37 = vpop.permute.xlu1 %1081 }
 0x2b5   : > { %v1125_v52 = vsel %vm1124_vm5, %v1123_v45, %v1121_v49  ;;  %v1131_v55 = vperm.slane %v1082_v37, %v1130_v51 }
 0x2b6   : > { %v1129_v58 = vsel %vm1128_vm6, %v1127_v53, %v1125_v52 }
 0x2b7   : > { %v1091_v47 = vpop.permute.xlu2 %1090  ;;  %v1133_v61 = vsel %vm1132_vm7, %v1131_v55, %v1129_v58 }
 0x2b8   : > { %v1137_v3 = vsel %vm1136_vm8, %v1135_v0, %v1133_v61  ;;  %v1143_v6 = vperm.slane %v1091_v47, %v1142_v1 }
 0x2c4   : > { %v1088_v44 = vpop.permute.xlu1 %1087 }
 0x2c5   : > { %v1139_v62 = vperm.slane %v1088_v44, %v1138_v56 }
 0x2c7   : > { %v1141_v39 = vsel %vm1140_vm9, %v1139_v62, %v1137_v3 }
 0x2c8   : > { %v1145_v11 = vsel %vm1144_vm10, %v1143_v6, %v1141_v39 }
 0x2cc   : > { %v1100_v59 = vpop.permute.xlu2 %1099 }
 0x2cd   : > { %v1155_v15 = vperm.slane %v1100_v59, %v1154_v9 }
 0x2d4   : > { %v1094_v54 = vpop.permute.xlu1 %1093 }
 0x2d5   : > { %v1147_v5 = vperm.slane %v1094_v54, %v1146_v63 }
 0x2d7   : > { %v1149_v13 = vsel %vm1148_vm11, %v1147_v5, %v1145_v11 }
 0x2dc   : > { %v1097_v60 = vpop.permute.xlu0 %1096 }
 0x2dd   : > { %v1151_v7 = vperm.slane %v1097_v60, %v1150_v2 }
 0x2df   : > { %v1153_v50 = vsel %vm1152_vm12, %v1151_v7, %v1149_v13 }
 0x2e0   : > { %v1157_v20 = vsel %vm1156_vm13, %v1155_v15, %v1153_v50 }
 0x2e4   : > { %v1109_v12 = vpop.permute.xlu2 %1108 }
 0x2e5   : > { %v1167_v26 = vperm.slane %v1109_v12, %v1166_v18 }
 0x2ec   : > { %v1103_v4 = vpop.permute.xlu1 %1102 }
 0x2ed   : > { %v1159_v14 = vperm.slane %v1103_v4, %v1158_v8 }
 0x2ef   : > { %v1161_v21 = vsel %vm1160_vm14, %v1159_v14, %v1157_v20 }
 0x2f4   : > { %v1106_v48 = vpop.permute.xlu0 %1105 }
 0x2f5   : > { %v1163_v16 = vperm.slane %v1106_v48, %v1162_v10 }
 0x2f7   : > { %v1165_v23 = vsel %vm1164_vm15, %v1163_v16, %v1161_v21 }
 0x2f8   : > { %v1169_v29 = vsel %vm1168_vm0, %v1167_v26, %v1165_v23 }
 0x2fc   : > { %v1118_v27 = vpop.permute.xlu2 %1117 }
 0x2fd   : > { %v1179_v31 = vperm.slane %v1118_v27, %v1178_v24 }
 0x304   : > { %v1112_v19 = vpop.permute.xlu1 %1111 }
 0x305   : > { %v1171_v25 = vperm.slane %v1112_v19, %v1170_v17 }
 0x307   : > { %v1173_v32 = vsel %vm1172_vm1, %v1171_v25, %v1169_v29 }
 0x30c   : > { %v1115_v28 = vpop.permute.xlu0 %1114 }
 0x30d   : > { %v1175_v30 = vperm.slane %v1115_v28, %v1174_v22 }
 0x30f   : > { %v1177_v33 = vsel %vm1176_vm2, %v1175_v30, %v1173_v32 }
 0x310   : > { %v1181_v34 = vsel %vm1180_vm3, %v1179_v31, %v1177_v33 }
 0x311   : > { %1183 = vst [vmem:[%s350_s8] sm:$0x1] %v1181_v34 }
 0x312   : > { %1515 = shalt.err (!%p1512_p5)
}
 0x313   : > { %1425 = dma.vmem_to_hbm [thread:$0]  (%p1644_p4), %s1197_s14, 16, %s1199_s15, %s1185_s24  }
 0x314 PF: > { %p1431_p6 = scmp.ge.s32.totalorder %s1566_s26, 2  ;;  %s1210_s11 = sand.u32 1, %s1546_s21  }
 0x315   : > { %s1211_s16 = scalar_lea.sflag [#allocation3], %s1210_s11 }
 0x316   : > { %p1428_p7 = pnand %p1431_p6, %p1651_p8 }
 0x318   : > { %p1429_p9 = pneg %p1428_p7 }
 0x31a   : > { %1541 = dma.done.wait (%p1429_p9), %s1211_s16, 16  }
 0x31b   : > { %1543 = vsyncadd (%p1429_p9), %s1211_s16, 4294967280  ;;  %s19_s26 = sadd.s32 1, %s1566_s26   ;;  %s1940_s21 = smov %s1550_s22 }
 0x31c   : > { %p16_p10 = scmp.ge.s32.totalorder %s19_s26, 5   ;;  %s1941_s22 = smov %s1554_s23 }
 0x31d   : > { %s1942_s23 = smov %s1657_s10  ;;  %s1943_s24 = smov %s1562_s25 }
 0x31e   : > { %s1944_s25 = smov %s1946_s29  ;;  %18 = sbr.rel (!%p16_p10) target bundleno = 4 (0x4), region = 95 }
 0x323   :  { %1216 = vsyncpa [#allocation3], 1 }
 0x324   :  { %1218 = vsyncpa [#allocation3 + $0x1], 1 }

</bundles_post_ra>
